<compile_context>
chip_gen: v7x
topology: tpu7x:2x2x1
jax: 0.10.0
libtpu: 0.0.40
codegen_flags: <defaults>
</compile_context>

<pallas_src>
import functools

import jax
import jax.numpy as jnp
from jax.experimental import pallas as pl
from jax.experimental.pallas import tpu as pltpu

LANE = 128           # TPU lane width
BATCH_TILE = 2048    # batch lanes per grid step; footprint ~1 MiB << VMEM on all chips


def _round_up(x, m):
    return ((x + m - 1) // m) * m


def init_params(key, state_dim, action_dim, hidden_dim=64):
    """PyTorch nn.Linear-style params: weight (out_features, in_features), bias (out_features,)."""
    d_in = state_dim + action_dim + state_dim
    dims = [(d_in, hidden_dim), (hidden_dim, hidden_dim // 2), (hidden_dim // 2, 1)]
    ks = jax.random.split(key, 2 * len(dims))
    params = []
    for li, (fan_in, fan_out) in enumerate(dims):
        bound = 1.0 / (fan_in ** 0.5)
        w = jax.random.uniform(ks[2 * li], (fan_out, fan_in), jnp.float32, -bound, bound)
        b = jax.random.uniform(ks[2 * li + 1], (fan_out,), jnp.float32, -bound, bound)
        params.append((w, b))
    return params


@functools.partial(jax.jit, static_argnames=("batch_tile",))
def reward_predictor_forward(state, action, next_state, params, *, batch_tile=BATCH_TILE):
    """Matches RewardPredictor.forward: cat along dim=1, MLP, squeeze(1) -> (B,)."""
    (w1, b1), (w2, b2), (w3, b3) = params
    B, S = state.shape
    A = action.shape[1]
    D_in = S + A + S
    H = w1.shape[0]
    H2 = w2.shape[0]

    # ---- batch tiling: lanes padded to 128; tile multiple of 128; >=2 steps when possible
    b_lane = _round_up(max(B, 1), LANE)
    tb_cap = min(batch_tile, b_lane)
    if b_lane >= 2 * LANE:  # give v7x megacore at least two balanced grid steps
        tb_cap = min(tb_cap, _round_up(-(-b_lane // 2), LANE))
    tb = max(LANE, (tb_cap // LANE) * LANE)
    b_pad = _round_up(b_lane, tb)
    grid = (b_pad // tb,)

    # ---- fused wrapper preprocessing: one bf16 concat -> transpose -> pad slab
    x = jnp.concatenate(
        [jnp.asarray(state, jnp.float32).astype(jnp.bfloat16),
         jnp.asarray(action, jnp.float32).astype(jnp.bfloat16),
         jnp.asarray(next_state, jnp.float32).astype(jnp.bfloat16)],
        axis=1)                                                   # (B, D_in) bf16
    x_t = jnp.pad(x, ((0, b_pad - B), (0, 0))).T                  # (D_in, b_pad) bf16

    w1_b = w1.astype(jnp.bfloat16)                                # (H,  D_in)
    w2_b = w2.astype(jnp.bfloat16)                                # (H2, H)

    # ---- pack tiny constants (b1, b2, w3 column, b3) into one f32 (N, 1) resident slab
    segs, offs, off = [], [], 0
    for arr in (b1.reshape(H, 1), b2.reshape(H2, 1), w3.reshape(H2, 1), b3.reshape(1, 1)):
        n = arr.shape[0]
        n_pad = _round_up(n, 8)
        segs.append(jnp.pad(arr.astype(jnp.float32), ((0, n_pad - n), (0, 0))))
        offs.append(off)
        off += n_pad
    consts = jnp.concatenate(segs, axis=0)                        # (off, 1) f32
    o_b1, o_b2, o_w3, o_b3 = offs

    # ---- kernel (closure over static dims / offsets)
    def reward_mlp_kernel(x_ref, w1_ref, w2_ref, c_ref, o_ref):
        # x_ref: (D_in, TB) bf16   w1_ref: (H, D_in) bf16   w2_ref: (H2, H) bf16
        # c_ref: (off, 1)   f32    o_ref : (1, TB)   f32
        # Layer 1: single fused-concat matmul, f32 accumulation, f32 bias + ReLU.
        h1 = jnp.dot(w1_ref[...], x_ref[...], preferred_element_type=jnp.float32)
        h1 = jnp.maximum(h1 + c_ref[o_b1:o_b1 + H, :], 0.0)       # (H, TB) f32
        # Layer 2.
        h2 = jnp.dot(w2_ref[...], h1.astype(jnp.bfloat16),
                     preferred_element_type=jnp.float32)
        h2 = jnp.maximum(h2 + c_ref[o_b2:o_b2 + H2, :], 0.0)      # (H2, TB) f32
        # Layer 3 (out_features = 1): VPU multiply + sublane reduce -> lane-dense (1, TB).
        out = (jnp.sum(h2 * c_ref[o_w3:o_w3 + H2, :], axis=0, keepdims=True)
               + c_ref[o_b3:o_b3 + 1, :])
        o_ref[...] = out

    def resident(shape):
        return pl.BlockSpec(shape, lambda i: (0, 0))

    flops = 2 * B * (D_in * H + H * H2 + H2) + B * (H + H2 + 1)
    bytes_accessed = (B * D_in * 2 + B * 4
                      + (w1_b.size + w2_b.size) * 2 + consts.size * 4)

    out = pl.pallas_call(
        reward_mlp_kernel,
        out_shape=jax.ShapeDtypeStruct((1, b_pad), jnp.float32),
        grid=grid,
        in_specs=[
            pl.BlockSpec((D_in, tb), lambda i: (0, i)),           # streamed activations
            resident((H, D_in)),                                  # w1 (resident)
            resident((H2, H)),                                    # w2 (resident)
            resident((off, 1)),                                   # packed consts (resident)
        ],
        out_specs=pl.BlockSpec((1, tb), lambda i: (0, i)),
        compiler_params=pltpu.CompilerParams(
            dimension_semantics=("parallel",),
            vmem_limit_bytes=32 * 1024 * 1024,
        ),
        cost_estimate=pl.CostEstimate(
            flops=int(flops), transcendentals=0, bytes_accessed=int(bytes_accessed)),
    )(x_t, w1_b, w2_b, consts)

    return out[0, :B]  # squeeze(1) -> (B,)


def reference_forward(state, action, next_state, params):
    """Pure-JAX reference mirroring the kernel numerics (bf16 operands, f32 accumulation)."""
    (w1, b1), (w2, b2), (w3, b3) = params
    x = jnp.concatenate(
        [jnp.asarray(state, jnp.float32), jnp.asarray(action, jnp.float32),
         jnp.asarray(next_state, jnp.float32)], axis=1)
    h1 = jnp.dot(x.astype(jnp.bfloat16), w1.T.astype(jnp.bfloat16),
                 preferred_element_type=jnp.float32) + b1
    h1 = jnp.maximum(h1, 0.0)
    h2 = jnp.dot(h1.astype(jnp.bfloat16), w2.T.astype(jnp.bfloat16),
                 preferred_element_type=jnp.float32) + b2
    h2 = jnp.maximum(h2, 0.0)
    out = h2 @ w3.T.astype(jnp.float32) + b3
    return out[:, 0]


if __name__ == "__main__":
    # Small Reacher-like shapes.
    batch, state_dim, action_dim, hidden_dim = 2, 8, 2, 64

    key = jax.random.PRNGKey(0)
    k_state, k_action, k_next, k_params = jax.random.split(key, 4)

    state = jax.random.normal(k_state, (batch, state_dim), jnp.float32)
    action = jax.random.normal(k_action, (batch, action_dim), jnp.float32)
    next_state = jax.random.normal(k_next, (batch, state_dim), jnp.float32)

    params = init_params(k_params, state_dim, action_dim, hidden_dim)

    out = reward_predictor_forward(state, action, next_state, params)
    out = jax.block_until_ready(out)

    ref = reference_forward(state, action, next_state, params)
    assert out.shape == (batch,)
    assert jnp.allclose(out, ref, atol=2e-3, rtol=2e-3), (out, ref)

    print("KERNEL_OK")
</pallas_src>

<mosaic_0001>
module attributes {stable_mosaic.version = 11 : i64} {
  func.func @reward_mlp_kernel(%arg0: i32, %arg1: memref<18x128xbf16, #tpu.memory_space<vmem>>, %arg2: memref<64x18xbf16, #tpu.memory_space<vmem>>, %arg3: memref<32x64xbf16, #tpu.memory_space<vmem>>, %arg4: memref<136x1xf32, #tpu.memory_space<vmem>>, %arg5: memref<1x128xf32, #tpu.memory_space<vmem>>) attributes {dimension_semantics = [#tpu.dimension_semantics<parallel>], iteration_bounds = array<i64: 1>, scalar_prefetch = 0 : i64, scratch_operands = 0 : i64, tpu.core_type = #tpu.core_type<tc>, window_params = [{transform_indices = @transform_0, window_bounds = array<i64: 18, 128>}, {pipeline_mode = #tpu.pipeline_mode<synchronous>, transform_indices = @transform_1, window_bounds = array<i64: 64, 18>}, {pipeline_mode = #tpu.pipeline_mode<synchronous>, transform_indices = @transform_2, window_bounds = array<i64: 32, 64>}, {pipeline_mode = #tpu.pipeline_mode<synchronous>, transform_indices = @transform_3, window_bounds = array<i64: 136, 1>}, {transform_indices = @transform_4, window_bounds = array<i64: 1, 128>}]} {
    %c0 = arith.constant 0 : index
    %c0_0 = arith.constant 0 : index
    %0 = vector.load %arg2[%c0, %c0_0] : memref<64x18xbf16, #tpu.memory_space<vmem>>, vector<64x18xbf16>
    %c0_1 = arith.constant 0 : index
    %c0_2 = arith.constant 0 : index
    %1 = vector.load %arg1[%c0_1, %c0_2] : memref<18x128xbf16, #tpu.memory_space<vmem>>, vector<18x128xbf16>
    %cst = arith.constant dense<0.000000e+00> : vector<64x128xf32>
    %2 = tpu.matmul %0, %1, %cst {dimension_numbers = #tpu.dot_dimension_numbers<[1], [0], [0], [1], [0, 0, 1, 1], [], []>} : vector<64x18xbf16>, vector<18x128xbf16>, vector<64x128xf32> -> vector<64x128xf32>
    %c0_3 = arith.constant 0 : index
    %c0_4 = arith.constant 0 : index
    %3 = vector.load %arg4[%c0_3, %c0_4] : memref<136x1xf32, #tpu.memory_space<vmem>>, vector<64x1xf32>
    %4 = vector.broadcast %3 : vector<64x1xf32> to vector<64x128xf32>
    %5 = arith.addf %2, %4 : vector<64x128xf32>
    %cst_5 = arith.constant 0.000000e+00 : f32
    %6 = vector.broadcast %cst_5 : f32 to vector<64x128xf32>
    %7 = arith.maximumf %5, %6 : vector<64x128xf32>
    %c0_6 = arith.constant 0 : index
    %c0_7 = arith.constant 0 : index
    %8 = vector.load %arg3[%c0_6, %c0_7] : memref<32x64xbf16, #tpu.memory_space<vmem>>, vector<32x64xbf16>
    %9 = arith.truncf %7 : vector<64x128xf32> to vector<64x128xbf16>
    %cst_8 = arith.constant dense<0.000000e+00> : vector<32x128xf32>
    %10 = tpu.matmul %8, %9, %cst_8 {dimension_numbers = #tpu.dot_dimension_numbers<[1], [0], [0], [1], [0, 0, 1, 1], [], []>} : vector<32x64xbf16>, vector<64x128xbf16>, vector<32x128xf32> -> vector<32x128xf32>
    %c64 = arith.constant 64 : index
    %c0_9 = arith.constant 0 : index
    %11 = vector.load %arg4[%c64, %c0_9] : memref<136x1xf32, #tpu.memory_space<vmem>>, vector<32x1xf32>
    %12 = vector.broadcast %11 : vector<32x1xf32> to vector<32x128xf32>
    %13 = arith.addf %10, %12 : vector<32x128xf32>
    %cst_10 = arith.constant 0.000000e+00 : f32
    %14 = vector.broadcast %cst_10 : f32 to vector<32x128xf32>
    %15 = arith.maximumf %13, %14 : vector<32x128xf32>
    %c96 = arith.constant 96 : index
    %c0_11 = arith.constant 0 : index
    %16 = vector.load %arg4[%c96, %c0_11] : memref<136x1xf32, #tpu.memory_space<vmem>>, vector<32x1xf32>
    %17 = vector.broadcast %16 : vector<32x1xf32> to vector<32x128xf32>
    %18 = arith.mulf %15, %17 : vector<32x128xf32>
    %cst_12 = arith.constant dense<0.000000e+00> : vector<128xf32>
    %19 = vector.multi_reduction <add>, %18, %cst_12 [0] : vector<32x128xf32> to vector<128xf32>
    %20 = vector.shape_cast %19 : vector<128xf32> to vector<1x128xf32>
    %c128 = arith.constant 128 : index
    %c0_13 = arith.constant 0 : index
    %21 = vector.load %arg4[%c128, %c0_13] : memref<136x1xf32, #tpu.memory_space<vmem>>, vector<1x1xf32>
    %22 = vector.broadcast %21 : vector<1x1xf32> to vector<1x128xf32>
    %23 = arith.addf %20, %22 : vector<1x128xf32>
    %c0_14 = arith.constant 0 : index
    %c0_15 = arith.constant 0 : index
    %24 = vector.load %arg5[%c0_14, %c0_15] : memref<1x128xf32, #tpu.memory_space<vmem>>, vector<1x128xf32>
    tpu.vector_store %arg5[%c0_14, %c0_15], %23 {strides = array<i32>} : memref<1x128xf32, #tpu.memory_space<vmem>>, vector<1x128xf32>,
    return
  }
  func.func @transform_0(%arg0: i32) -> (i32, i32) {
    %c0_i32 = arith.constant 0 : i32
    %c0_i32_0 = arith.constant 0 : i32
    return %c0_i32, %arg0 : i32, i32
  }
  func.func @transform_1(%arg0: i32) -> (i32, i32) {
    %c0_i32 = arith.constant 0 : i32
    %c0_i32_0 = arith.constant 0 : i32
    %c0_i32_1 = arith.constant 0 : i32
    return %c0_i32, %c0_i32_0 : i32, i32
  }
  func.func @transform_2(%arg0: i32) -> (i32, i32) {
    %c0_i32 = arith.constant 0 : i32
    %c0_i32_0 = arith.constant 0 : i32
    %c0_i32_1 = arith.constant 0 : i32
    return %c0_i32, %c0_i32_0 : i32, i32
  }
  func.func @transform_3(%arg0: i32) -> (i32, i32) {
    %c0_i32 = arith.constant 0 : i32
    %c0_i32_0 = arith.constant 0 : i32
    %c0_i32_1 = arith.constant 0 : i32
    return %c0_i32, %c0_i32_0 : i32, i32
  }
  func.func @transform_4(%arg0: i32) -> (i32, i32) {
    %c0_i32 = arith.constant 0 : i32
    %c0_i32_0 = arith.constant 0 : i32
    return %c0_i32, %arg0 : i32, i32
  }
}

</mosaic_0001>

<bundles_post_ra>
// kernel: reward_predictor_forward.1
= control target key start
LH: loop header
LB: loop body
LE: loop exit
PB: predicated region body
PF: predicated region fallthrough
CT: control target
= control target key end

     0   :  { %vm106_vm0 = vcmask 146432   ;;  %v409_v0 = vmov 0   ;;  %vm119_vm1 = vcmask 1040384   ;;  %vm238_vm2 = vcmask 523264   ;;  %s519_s0 = inlined_call_operand.vmem [shape: bf16[18,128], index: 0, kind: input, shape index: {}]   ;;  %s520_s1 = inlined_call_operand.vmem [shape: bf16[64,18], index: 1, kind: input, shape index: {}]   ;;  %s521_s3 = inlined_call_operand.vmem [shape: f32[136,1], index: 3, kind: input, shape index: {}]   ;;  %s522_s2 = inlined_call_operand.vmem [shape: bf16[32,64], index: 2, kind: input, shape index: {}]   ;;  %s523_s4 = inlined_call_operand.vmem [shape: f32[1,128], index: 4, kind: output, shape index: {}]  }
   0x1   :  { %399 = vset.pattern.permute.xlu0 %v409_v0  ;;  %400 = vset.pattern.permute.xlu1 %v409_v0  ;;  %v401_v1 = vld [vmem:[%s519_s0] sm:$0xff]   ;;  %v402_v2 = vld [vmem:[%s519_s0 + $0x8] ss:$0 sps:$4 sm:$0x11]   ;;  %v31_v6 = vld [vmem:[%s521_s3 + $0x10] sm:$0xff] }
   0x2   :  { %v403_v3 = vld [vmem:[%s520_s1] sm:$0xff]   ;;  %373 = vmatprep.subr.bf16.mxu0 %v401_v1  ;;  %v121_v4 = vsel %vm119_vm1, %v402_v2, 0  ;;  %v404_v7 = vld [vmem:[%s520_s1 + $0x8] sm:$0xff]   ;;  %49 = vperm.xlu1 %400, %v31_v6   ;;  %v405_v9 = vld [vmem:[%s520_s1 + $0x10] sm:$0xff]  }
   0x3   :  { %374 = vmatpush3.bf16.msra.mxu0 %v401_v1  ;;  %377 = vmatprep.mubr.msk.bf16.mxu0 %vm106_vm0, %v403_v3  ;;  %v29_v5 = vld [vmem:[%s521_s3] sm:$0xff]  ;;  %v30_v8 = vld [vmem:[%s521_s3 + $0x8] sm:$0xff]  ;;  %v32_v10 = vld [vmem:[%s521_s3 + $0x18] sm:$0xff] }
   0x4   :  { %397 = vmatprep.subr.msk.bf16.mxu0 %vm119_vm1, %v402_v2  ;;  %39 = vperm.xlu0 %399, %v29_v5   ;;  %v33_v11 = vld [vmem:[%s521_s3 + $0x20] sm:$0xff]  ;;  %v34_v12 = vld [vmem:[%s521_s3 + $0x28] sm:$0xff]  ;;  %v406_v13 = vld [vmem:[%s520_s1 + $0x18] sm:$0xff]  }
   0x5   :  { %v35_v14 = vld [vmem:[%s521_s3 + $0x30] sm:$0xff]  ;;  %v36_v15 = vld [vmem:[%s521_s3 + $0x38] sm:$0xff]  ;;  %v204_v16 = vld [vmem:[%s521_s3 + $0x40] sm:$0xff] }
   0x6   :  { %54 = vperm.xlu1 %400, %v32_v10   ;;  %v205_v17 = vld [vmem:[%s521_s3 + $0x48] sm:$0xff]  ;;  %v206_v18 = vld [vmem:[%s521_s3 + $0x50] sm:$0xff]  ;;  %v207_v19 = vld [vmem:[%s521_s3 + $0x58] sm:$0xff] }
   0x7   :  { %376 = vmatpush3.bf16.msra.mxu0 %v121_v4  ;;  %v298_v20 = vld [vmem:[%s521_s3 + $0x60] sm:$0xff]  ;;  %v299_v21 = vld [vmem:[%s521_s3 + $0x68] sm:$0xff]  ;;  %v300_v22 = vld [vmem:[%s521_s3 + $0x70] sm:$0xff] }
   0x8   :  { %44 = vperm.xlu0 %399, %v30_v8   ;;  %v301_v23 = vld [vmem:[%s521_s3 + $0x78] sm:$0xff]  ;;  %v335_v24 = vld [vmem:[%s521_s3 + $0x80] sm:$0x1]  ;;  %v408_v62 = vld [vmem:[%s522_s2 + $0x8] sm:$0xff]  }
   0x9   :  { %v407_v25 = vld [vmem:[%s522_s2] sm:$0xff]  }
   0xa   :  { %378 = vmatmul.mubr.msk.bf16.vlgmr.msra.gmra.mrb[0].mxu0 %vm106_vm0, %v404_v7  ;;  %64 = vperm.xlu1 %400, %v34_v12  }
   0xb   :  { %381 = vmatprep.mubr.msk.bf16.mxu0 %vm106_vm0, %v405_v9  ;;  %393 = vmatprep.mubr.msk.bf16.mxu1 %vm238_vm2, %v407_v25 }
   0xc   :  { %59 = vperm.xlu0 %399, %v33_v11  }
   0xe   :  { %74 = vperm.xlu1 %400, %v36_v15  }
  0x10   :  { %69 = vperm.xlu0 %399, %v35_v14  }
  0x12   :  { %382 = vmatmul.mubr.msk.bf16.gmra.mrb[4].mxu0 %vm106_vm0, %v406_v13  ;;  %215 = vperm.xlu1 %400, %v205_v17  }
  0x14   :  { %210 = vperm.xlu0 %399, %v204_v16  }
  0x16   :  { %225 = vperm.xlu1 %400, %v207_v19  }
  0x18   :  { %220 = vperm.xlu0 %399, %v206_v18  }
  0x1a   :  { %309 = vperm.xlu1 %400, %v299_v21  }
  0x1c   :  { %304 = vperm.xlu0 %399, %v298_v20  }
  0x1e   :  { %319 = vperm.xlu1 %400, %v301_v23  }
  0x20   :  { %314 = vperm.xlu0 %399, %v300_v22  }
  0x24   :  { %338 = vperm.xlu0 %399, %v335_v24  }
  0x81   :  { %v50_v27 = vpop.permute.xlu1 %49 }
  0x83   :  { %v40_v26 = vpop.permute.xlu0 %39 }
  0x85   :  { %v55_v29 = vpop.permute.xlu1 %54 }
  0x87   :  { %v45_v28 = vpop.permute.xlu0 %44 }
  0x89   :  { %v65_v38 = vpop.permute.xlu1 %64 }
  0x8b   :  { %v60_v33 = vpop.permute.xlu0 %59 }
  0x8d   :  { %v75_v50 = vpop.permute.xlu1 %74 }
  0x8f   :  { %v70_v45 = vpop.permute.xlu0 %69 }
  0x91   :  { %v216_v0 = vpop.permute.xlu1 %215 }
  0x93   :  { %v211_v63 = vpop.permute.xlu0 %210 }
  0x95   :  { %v226_v2 = vpop.permute.xlu1 %225 }
  0x97   :  { %v221_v1 = vpop.permute.xlu0 %220 }
  0x99   :  { %v310_v13 = vpop.permute.xlu1 %309 }
  0x9b   :  { %v305_v8 = vpop.permute.xlu0 %304 }
  0x9d   :  { %v320_v22 = vpop.permute.xlu1 %319 }
  0x9f   :  { %v315_v19 = vpop.permute.xlu0 %314 }
  0xdd   :  { %v379_v30 = vpop.f32.mrb[0].mxu0 }
  0xde   :  { %v166_v31 = vadd.f32 %v379_v30, %v50_v27  ;;  %v157_v32 = vpop.f32.mrb[1].mxu0 }
  0xdf   :  { %v158_v34 = vadd.f32 %v157_v32, %v40_v26  ;;  %v380_v35 = vpop.f32.mrb[2].mxu0  ;;  %v339_v32 = vpop.permute.xlu0 %338 }
  0xe0   :  { %v169_v36 = vadd.f32 %v380_v35, %v55_v29  ;;  %v160_v37 = vpop.f32.mrb[3].mxu0  ;;  %v190_v40 = vmax.f32 %v166_v31, 0.0 }
  0xe1   :  { %v161_v39 = vadd.f32 %v160_v37, %v45_v28  ;;  %v188_v42 = vmax.f32 %v158_v34, 0.0 }
  0xe2   :  { %v191_v41 = vmax.f32 %v169_v36, 0.0 }
  0xe3   :  { %v189_v43 = vmax.f32 %v161_v39, 0.0 }
  0xe4   :  { %v201_v44 = vpack.c.bf16 %v191_v41, %v190_v40 }
  0xe5   :  { %v383_v46 = vpop.f32.mrb[4].mxu0  ;;  %v200_v47 = vpack.c.bf16 %v189_v43, %v188_v42 }
  0xe6   :  { %v182_v48 = vadd.f32 %v383_v46, %v70_v45  ;;  %v173_v49 = vpop.f32.mrb[5].mxu0 }
  0xe7   :  { %v174_v51 = vadd.f32 %v173_v49, %v60_v33  ;;  %v384_v52 = vpop.f32.mrb[6].mxu0  ;;  %385 = vmatprep.subr.bf16.mxu1 %v200_v47 }
  0xe8   :  { %v185_v53 = vadd.f32 %v384_v52, %v75_v50  ;;  %v176_v54 = vpop.f32.mrb[7].mxu0  ;;  %386 = vmatpush3.bf16.msra.mxu1 %v200_v47  ;;  %v194_v56 = vmax.f32 %v182_v48, 0.0 }
  0xe9   :  { %v177_v55 = vadd.f32 %v176_v54, %v65_v38  ;;  %387 = vmatprep.subr.bf16.mxu1 %v201_v44  ;;  %v192_v58 = vmax.f32 %v174_v51, 0.0 }
  0xea   :  { %v195_v57 = vmax.f32 %v185_v53, 0.0 }
  0xeb   :  { %v193_v59 = vmax.f32 %v177_v55, 0.0 }
  0xec   :  { %v203_v60 = vpack.c.bf16 %v195_v57, %v194_v56  ;;  %388 = vmatpush3.bf16.msra.mxu1 %v201_v44 }
  0xed   :  { %v202_v61 = vpack.c.bf16 %v193_v59, %v192_v58 }
  0xef   :  { %389 = vmatprep.subr.bf16.mxu1 %v202_v61 }
  0xf0   :  { %390 = vmatpush3.bf16.msra.mxu1 %v202_v61 }
  0xf1   :  { %391 = vmatprep.subr.bf16.mxu1 %v203_v60 }
  0xf4   :  { %392 = vmatpush3.bf16.msra.mxu1 %v203_v60 }
  0xf7   :  { %394 = vmatmul.mubr.msk.bf16.vlgmr.msra.gmra.mrb[0].mxu1 %vm238_vm2, %v408_v62 }
 0x1ca   :  { %v395_v3 = vpop.f32.mrb[0].mxu1 }
 0x1cb   :  { %v279_v4 = vpop.f32.mrb[1].mxu1  ;;  %v288_v5 = vadd.f32 %v395_v3, %v221_v1 }
 0x1cc   :  { %v280_v6 = vadd.f32 %v279_v4, %v211_v63  ;;  %v396_v7 = vpop.f32.mrb[2].mxu1 }
 0x1cd   :  { %v282_v9 = vpop.f32.mrb[3].mxu1  ;;  %v291_v11 = vadd.f32 %v396_v7, %v226_v2  ;;  %v296_v14 = vmax.f32 %v288_v5, 0.0 }
 0x1ce   :  { %v294_v10 = vmax.f32 %v280_v6, 0.0  ;;  %v283_v12 = vadd.f32 %v282_v9, %v216_v0 }
 0x1cf   :  { %v297_v17 = vmax.f32 %v291_v11, 0.0  ;;  %v324_v20 = vmul.f32 %v315_v19, %v296_v14 }
 0x1d0   :  { %v295_v15 = vmax.f32 %v283_v12, 0.0  ;;  %v322_v16 = vmul.f32 %v305_v8, %v294_v10 }
 0x1d1   :  { %v325_v23 = vmul.f32 %v320_v22, %v297_v17 }
 0x1d2   :  { %v323_v18 = vmul.f32 %v310_v13, %v295_v15 }
 0x1d4   :  { %v326_v21 = vadd.f32 %v323_v18, %v322_v16 }
 0x1d6   :  { %v327_v24 = vadd.f32 %v326_v21, %v324_v20 }
 0x1d8   :  { %v328_v25 = vadd.f32 %v327_v24, %v325_v23 }
 0x1da   :  { %v329_v26 = vrot.slane %v328_v25, 4 }
 0x1dc   :  { %v330_v27 = vadd.f32 %v329_v26, %v328_v25 }
 0x1de   :  { %v331_v28 = vrot.slane %v330_v27, 2 }
 0x1e0   :  { %v332_v29 = vadd.f32 %v331_v28, %v330_v27 }
 0x1e2   :  { %v333_v30 = vrot.slane %v332_v29, 1 }
 0x1e4   :  { %v334_v31 = vadd.f32 %v333_v30, %v332_v29 }
 0x1e6   :  { %v341_v33 = vadd.f32 %v339_v32, %v334_v31 }
 0x1e8   :  { %342 = vst [vmem:[%s523_s4] sm:$0x1] %v341_v33 }

</bundles_post_ra>
